<compile_context>
chip_gen: v7x
topology: tpu7x:2x2x1
jax: 0.10.0
libtpu: 0.0.40
codegen_flags: <defaults>
</compile_context>

<pallas_src>
import jax
import jax.numpy as jnp
from jax.experimental import pallas as pl
from jax.experimental.pallas import tpu as pltpu

LN_EPS = 1e-5
_SUBLANE = 8
_MAX_ROW_TILE = 1024


def _round_up(x, m):
    return (x + m - 1) // m * m


def _vmem_budget_and_limit():
    """Generation-aware VMEM budgeting (v5e/v6e: 128 MiB VMEM, v7x: 64 MiB)."""
    try:
        cap = int(pltpu.get_tpu_info().vmem_capacity_bytes)
    except Exception:
        cap = 64 * 1024 * 1024                       # conservative default (v7x-sized)
    if cap >= 100 * 1024 * 1024:                     # v5e / v6e (128 MiB physical)
        return 96 * 1024 * 1024, 110 * 1024 * 1024
    return 44 * 1024 * 1024, 52 * 1024 * 1024        # v7x (64 MiB physical)


def _invariant_spec(block_shape, index_map):
    """BlockSpec for a grid-invariant input: single-buffered when supported.

    Returns (spec, buffer_count) so the VMEM estimate can account for it.
    """
    try:
        spec = pl.BlockSpec(block_shape, index_map, pipeline_mode=pl.Buffered(1))
        return spec, 1
    except (TypeError, ValueError):                  # older jax: no pipeline_mode
        return pl.BlockSpec(block_shape, index_map), 2


def _choose_row_tile(rows, d, has_residual, act_itemsize, resident_bytes, budget):
    """Pick a row tile (multiple of 8) whose pipelined + temporary footprint fits."""
    n_row_arrays = 4 if has_residual else 2          # x, res in; hs, res out
    tr = min(_MAX_ROW_TILE, _round_up(rows, _SUBLANE))
    tr = max(_SUBLANE, (tr // _SUBLANE) * _SUBLANE)

    def est(t):
        pipelined = n_row_arrays * 2 * t * d * act_itemsize   # double-buffered I/O tiles
        temporaries = 4 * t * d * 4                           # live f32 temporaries in body
        return pipelined + temporaries + resident_bytes

    while tr > _SUBLANE and est(tr) > budget:
        tr = max(_SUBLANE, (tr // 2) // _SUBLANE * _SUBLANE)

    # Megacore (v7x has 2 TensorCores): keep >= 2 row tiles when rows allow it.
    if rows > _SUBLANE:
        half = max(_SUBLANE, (rows // 2) // _SUBLANE * _SUBLANE)
        if half < rows:
            tr = min(tr, half)
    return tr


def _make_block_kernel(mm_dtype, has_residual):
    """Builds the fused Add + LayerNorm + Linear-mixer kernel."""

    def kernel(*refs):
        if has_residual:
            (x_ref, res_ref, gamma_ref, beta_ref, w_ref, b_ref,
             hs_out_ref, res_out_ref) = refs
        else:
            x_ref, gamma_ref, beta_ref, w_ref, b_ref, hs_out_ref = refs

        # Hoisted parameter reads (once per row tile).
        gamma = gamma_ref[...].astype(jnp.float32)           # (1, D)
        beta = beta_ref[...].astype(jnp.float32)             # (1, D)
        bias = b_ref[...].astype(jnp.float32)                # (1, D)

        # ---- Add (residual update), f32 accumulation on the VPU ----
        x = x_ref[...].astype(jnp.float32)                   # (TR, D)
        if has_residual:
            residual = res_ref[...].astype(jnp.float32) + x
        else:
            residual = x

        # ---- LayerNorm over the full (un-padded) lane extent D ----
        inv_d = 1.0 / float(x.shape[-1])
        mean = jnp.sum(residual, axis=-1, keepdims=True) * inv_d
        centered = residual - mean
        var = jnp.sum(centered * centered, axis=-1, keepdims=True) * inv_d
        inv = jax.lax.rsqrt(var + LN_EPS)
        normed = centered * inv * gamma + beta

        # ---- Mixer: Linear(D, D) on the MXU (weight pre-cast to mm_dtype) ----
        mixed = jnp.dot(normed.astype(mm_dtype), w_ref[...],
                        preferred_element_type=jnp.float32) + bias

        hs_out_ref[...] = mixed.astype(hs_out_ref.dtype)
        if has_residual:
            res_out_ref[...] = residual.astype(res_out_ref.dtype)

    return kernel


def block_forward(hidden_states, residual, gamma, beta, w_mix, b_mix):
    """hidden_states: (B, L, D); residual: (B, L, D) or None.

    Returns (mixer_output, new_residual), both (B, L, D).
    """
    B, L, D = hidden_states.shape
    rows = B * L
    has_residual = residual is not None

    # bf16 MXU operands when the model runs in bf16; LayerNorm math stays f32.
    mm_dtype = (jnp.bfloat16
                if (hidden_states.dtype == jnp.bfloat16
                    or w_mix.dtype == jnp.bfloat16)
                else jnp.float32)

    # Activations are streamed un-padded: block last dim = D = full array extent.
    x2d = hidden_states.reshape(rows, D)
    gamma2d = gamma.reshape(1, D)
    beta2d = beta.reshape(1, D)
    b2d = b_mix.reshape(1, D)
    w2d = w_mix.astype(mm_dtype)                     # pre-cast once in the wrapper

    vec_spec, vec_bufs = _invariant_spec((1, D), lambda i: (0, 0))
    mat_spec, mat_bufs = _invariant_spec((D, D), lambda i: (0, 0))

    budget, vmem_limit = _vmem_budget_and_limit()
    resident_bytes = (mat_bufs * D * D * jnp.dtype(mm_dtype).itemsize
                      + 3 * vec_bufs * D * 4)
    tr = _choose_row_tile(rows, D, has_residual,
                          hidden_states.dtype.itemsize, resident_bytes, budget)

    grid = (pl.cdiv(rows, tr),)
    row_spec = pl.BlockSpec((tr, D), lambda i: (i, 0))

    kernel = _make_block_kernel(mm_dtype, has_residual)
    compiler_params = pltpu.CompilerParams(
        dimension_semantics=("parallel",),           # shard row tiles across TCs (v7x)
        vmem_limit_bytes=vmem_limit,
    )

    if has_residual:
        res2d = residual.reshape(rows, D)
        hs_out, res_out = pl.pallas_call(
            kernel,
            out_shape=(
                jax.ShapeDtypeStruct((rows, D), hidden_states.dtype),
                jax.ShapeDtypeStruct((rows, D), res2d.dtype),
            ),
            grid_spec=pltpu.PrefetchScalarGridSpec(
                num_scalar_prefetch=0,
                grid=grid,
                in_specs=[row_spec, row_spec, vec_spec, vec_spec, mat_spec, vec_spec],
                out_specs=[row_spec, row_spec],
            ),
            compiler_params=compiler_params,
            input_output_aliases={1: 1},             # residual input buffer -> residual out
        )(x2d, res2d, gamma2d, beta2d, w2d, b2d)
        return hs_out.reshape(B, L, D), res_out.reshape(B, L, D)

    # First block: residual is just hidden_states -- no fake zeros, no extra
    # residual output traffic.
    hs_out = pl.pallas_call(
        kernel,
        out_shape=jax.ShapeDtypeStruct((rows, D), hidden_states.dtype),
        grid_spec=pltpu.PrefetchScalarGridSpec(
            num_scalar_prefetch=0,
            grid=grid,
            in_specs=[row_spec, vec_spec, vec_spec, mat_spec, vec_spec],
            out_specs=row_spec,
        ),
        compiler_params=compiler_params,
    )(x2d, gamma2d, beta2d, w2d, b2d)
    return hs_out.reshape(B, L, D), hidden_states


def _reference(hidden_states, residual, gamma, beta, w_mix, b_mix):
    hs = hidden_states.astype(jnp.float32)
    res = hs if residual is None else residual.astype(jnp.float32) + hs
    mean = jnp.mean(res, axis=-1, keepdims=True)
    var = jnp.mean((res - mean) ** 2, axis=-1, keepdims=True)
    normed = (res - mean) * jax.lax.rsqrt(var + LN_EPS)
    normed = normed * gamma.astype(jnp.float32) + beta.astype(jnp.float32)
    mixed = normed @ w_mix.astype(jnp.float32) + b_mix.astype(jnp.float32)
    return mixed, res


if __name__ == "__main__":
    block_fwd = jax.jit(block_forward)

    def run_case(hs, res, gamma, beta, w, b, hs_tol, res_tol):
        out_hs, out_res = block_fwd(hs, res, gamma, beta, w, b)
        jax.block_until_ready((out_hs, out_res))
        ref_hs, ref_res = _reference(hs, res, gamma, beta, w, b)
        assert jnp.allclose(out_hs.astype(jnp.float32), ref_hs,
                            atol=hs_tol, rtol=hs_tol), "mixer output mismatch"
        assert jnp.allclose(out_res.astype(jnp.float32), ref_res,
                            atol=res_tol, rtol=res_tol), "residual mismatch"

    key = jax.random.PRNGKey(0)
    k_x, k_res, k_w, k_b, k_x2, k_res2, k_w2, k_b2 = jax.random.split(key, 8)

    # ---- Case 1 & 2: toy shape (B=2, L=8, D=32), f32, non-multiple-of-128 D ----
    B, L, D = 2, 8, 32
    hidden_states = jax.random.normal(k_x, (B, L, D), dtype=jnp.float32)
    residual = jax.random.normal(k_res, (B, L, D), dtype=jnp.float32)
    gamma = jnp.ones((D,), dtype=jnp.float32)
    beta = jnp.zeros((D,), dtype=jnp.float32)
    bound = 1.0 / (D ** 0.5)
    w_mix = jax.random.uniform(k_w, (D, D), jnp.float32, -bound, bound)
    b_mix = jax.random.uniform(k_b, (D,), jnp.float32, -bound, bound)

    run_case(hidden_states, residual, gamma, beta, w_mix, b_mix, 1e-4, 1e-5)
    run_case(hidden_states, None, gamma, beta, w_mix, b_mix, 1e-4, 1e-6)

    # ---- Case 3: larger shape -> multi-tile grid (>=2 steps for megacore) ----
    B2, L2, D2 = 2, 640, 256
    hs_big = jax.random.normal(k_x2, (B2, L2, D2), dtype=jnp.float32)
    res_big = jax.random.normal(k_res2, (B2, L2, D2), dtype=jnp.float32)
    gamma2 = jnp.ones((D2,), dtype=jnp.float32)
    beta2 = jnp.zeros((D2,), dtype=jnp.float32)
    bound2 = 1.0 / (D2 ** 0.5)
    w_big = jax.random.uniform(k_w2, (D2, D2), jnp.float32, -bound2, bound2)
    b_big = jax.random.uniform(k_b2, (D2,), jnp.float32, -bound2, bound2)
    run_case(hs_big, res_big, gamma2, beta2, w_big, b_big, 1e-3, 1e-5)

    # ---- Case 4: bf16 model path (bf16 MXU operands + bf16 outputs) ----
    run_case(hidden_states.astype(jnp.bfloat16), residual.astype(jnp.bfloat16),
             gamma, beta, w_mix.astype(jnp.bfloat16), b_mix.astype(jnp.bfloat16),
             0.1, 0.1)

    print("KERNEL_OK")
</pallas_src>

<mosaic_0001>
module attributes {stable_mosaic.version = 11 : i64} {
  func.func @kernel(%arg0: i32, %arg1: memref<8x32xf32, #tpu.memory_space<vmem>>, %arg2: memref<8x32xf32, #tpu.memory_space<vmem>>, %arg3: memref<1x32xf32, #tpu.memory_space<vmem>>, %arg4: memref<1x32xf32, #tpu.memory_space<vmem>>, %arg5: memref<32x32xf32, #tpu.memory_space<vmem>>, %arg6: memref<1x32xf32, #tpu.memory_space<vmem>>, %arg7: memref<8x32xf32, #tpu.memory_space<vmem>>, %arg8: memref<8x32xf32, #tpu.memory_space<vmem>>) attributes {dimension_semantics = [#tpu.dimension_semantics<parallel>], iteration_bounds = array<i64: 2>, scalar_prefetch = 0 : i64, scratch_operands = 0 : i64, tpu.core_type = #tpu.core_type<tc>, window_params = [{transform_indices = @transform_0, window_bounds = array<i64: 8, 32>}, {transform_indices = @transform_1, window_bounds = array<i64: 8, 32>}, {pipeline_mode = #tpu.pipeline_mode<synchronous>, transform_indices = @transform_2, window_bounds = array<i64: 1, 32>}, {pipeline_mode = #tpu.pipeline_mode<synchronous>, transform_indices = @transform_3, window_bounds = array<i64: 1, 32>}, {pipeline_mode = #tpu.pipeline_mode<synchronous>, transform_indices = @transform_4, window_bounds = array<i64: 32, 32>}, {pipeline_mode = #tpu.pipeline_mode<synchronous>, transform_indices = @transform_5, window_bounds = array<i64: 1, 32>}, {transform_indices = @transform_6, window_bounds = array<i64: 8, 32>}, {transform_indices = @transform_7, window_bounds = array<i64: 8, 32>}]} {
    %c0 = arith.constant 0 : index
    %c0_0 = arith.constant 0 : index
    %0 = vector.load %arg3[%c0, %c0_0] : memref<1x32xf32, #tpu.memory_space<vmem>>, vector<1x32xf32>
    %c0_1 = arith.constant 0 : index
    %c0_2 = arith.constant 0 : index
    %1 = vector.load %arg4[%c0_1, %c0_2] : memref<1x32xf32, #tpu.memory_space<vmem>>, vector<1x32xf32>
    %c0_3 = arith.constant 0 : index
    %c0_4 = arith.constant 0 : index
    %2 = vector.load %arg6[%c0_3, %c0_4] : memref<1x32xf32, #tpu.memory_space<vmem>>, vector<1x32xf32>
    %c0_5 = arith.constant 0 : index
    %c0_6 = arith.constant 0 : index
    %3 = vector.load %arg1[%c0_5, %c0_6] : memref<8x32xf32, #tpu.memory_space<vmem>>, vector<8x32xf32>
    %c0_7 = arith.constant 0 : index
    %c0_8 = arith.constant 0 : index
    %4 = vector.load %arg2[%c0_7, %c0_8] : memref<8x32xf32, #tpu.memory_space<vmem>>, vector<8x32xf32>
    %5 = arith.addf %4, %3 : vector<8x32xf32>
    %cst = arith.constant dense<0.000000e+00> : vector<8xf32>
    %6 = vector.multi_reduction <add>, %5, %cst [1] : vector<8x32xf32> to vector<8xf32>
    %7 = vector.shape_cast %6 : vector<8xf32> to vector<8x1xf32>
    %cst_9 = arith.constant 3.125000e-02 : f32
    %8 = vector.broadcast %cst_9 : f32 to vector<8x1xf32>
    %9 = arith.mulf %7, %8 : vector<8x1xf32>
    %10 = vector.broadcast %9 : vector<8x1xf32> to vector<8x32xf32>
    %11 = arith.subf %5, %10 : vector<8x32xf32>
    %12 = arith.mulf %11, %11 : vector<8x32xf32>
    %cst_10 = arith.constant dense<0.000000e+00> : vector<8xf32>
    %13 = vector.multi_reduction <add>, %12, %cst_10 [1] : vector<8x32xf32> to vector<8xf32>
    %14 = vector.shape_cast %13 : vector<8xf32> to vector<8x1xf32>
    %cst_11 = arith.constant 3.125000e-02 : f32
    %15 = vector.broadcast %cst_11 : f32 to vector<8x1xf32>
    %16 = arith.mulf %14, %15 : vector<8x1xf32>
    %cst_12 = arith.constant 9.99999974E-6 : f32
    %17 = vector.broadcast %cst_12 : f32 to vector<8x1xf32>
    %18 = arith.addf %16, %17 : vector<8x1xf32>
    %19 = math.rsqrt %18 : vector<8x1xf32>
    %20 = vector.broadcast %19 : vector<8x1xf32> to vector<8x32xf32>
    %21 = arith.mulf %11, %20 : vector<8x32xf32>
    %22 = vector.broadcast %0 : vector<1x32xf32> to vector<8x32xf32>
    %23 = arith.mulf %21, %22 : vector<8x32xf32>
    %24 = vector.broadcast %1 : vector<1x32xf32> to vector<8x32xf32>
    %25 = arith.addf %23, %24 : vector<8x32xf32>
    %c0_13 = arith.constant 0 : index
    %c0_14 = arith.constant 0 : index
    %26 = vector.load %arg5[%c0_13, %c0_14] : memref<32x32xf32, #tpu.memory_space<vmem>>, vector<32x32xf32>
    %cst_15 = arith.constant dense<0.000000e+00> : vector<8x32xf32>
    %27 = tpu.matmul %25, %26, %cst_15 {dimension_numbers = #tpu.dot_dimension_numbers<[1], [0], [0], [1], [0, 0, 1, 1], [], []>} : vector<8x32xf32>, vector<32x32xf32>, vector<8x32xf32> -> vector<8x32xf32>
    %28 = vector.broadcast %2 : vector<1x32xf32> to vector<8x32xf32>
    %29 = arith.addf %27, %28 : vector<8x32xf32>
    %c0_16 = arith.constant 0 : index
    %c0_17 = arith.constant 0 : index
    %30 = vector.load %arg7[%c0_16, %c0_17] : memref<8x32xf32, #tpu.memory_space<vmem>>, vector<8x32xf32>
    tpu.vector_store %arg7[%c0_16, %c0_17], %29 {strides = array<i32>} : memref<8x32xf32, #tpu.memory_space<vmem>>, vector<8x32xf32>,
    %c0_18 = arith.constant 0 : index
    %c0_19 = arith.constant 0 : index
    %31 = vector.load %arg8[%c0_18, %c0_19] : memref<8x32xf32, #tpu.memory_space<vmem>>, vector<8x32xf32>
    tpu.vector_store %arg8[%c0_18, %c0_19], %5 {strides = array<i32>} : memref<8x32xf32, #tpu.memory_space<vmem>>, vector<8x32xf32>,
    return
  }
  func.func @transform_0(%arg0: i32) -> (i32, i32) {
    %c0_i32 = arith.constant 0 : i32
    %c0_i32_0 = arith.constant 0 : i32
    return %arg0, %c0_i32 : i32, i32
  }
  func.func @transform_1(%arg0: i32) -> (i32, i32) {
    %c0_i32 = arith.constant 0 : i32
    %c0_i32_0 = arith.constant 0 : i32
    return %arg0, %c0_i32 : i32, i32
  }
  func.func @transform_2(%arg0: i32) -> (i32, i32) {
    %c0_i32 = arith.constant 0 : i32
    %c0_i32_0 = arith.constant 0 : i32
    %c0_i32_1 = arith.constant 0 : i32
    return %c0_i32, %c0_i32_0 : i32, i32
  }
  func.func @transform_3(%arg0: i32) -> (i32, i32) {
    %c0_i32 = arith.constant 0 : i32
    %c0_i32_0 = arith.constant 0 : i32
    %c0_i32_1 = arith.constant 0 : i32
    return %c0_i32, %c0_i32_0 : i32, i32
  }
  func.func @transform_4(%arg0: i32) -> (i32, i32) {
    %c0_i32 = arith.constant 0 : i32
    %c0_i32_0 = arith.constant 0 : i32
    %c0_i32_1 = arith.constant 0 : i32
    return %c0_i32, %c0_i32_0 : i32, i32
  }
  func.func @transform_5(%arg0: i32) -> (i32, i32) {
    %c0_i32 = arith.constant 0 : i32
    %c0_i32_0 = arith.constant 0 : i32
    %c0_i32_1 = arith.constant 0 : i32
    return %c0_i32, %c0_i32_0 : i32, i32
  }
  func.func @transform_6(%arg0: i32) -> (i32, i32) {
    %c0_i32 = arith.constant 0 : i32
    %c0_i32_0 = arith.constant 0 : i32
    return %arg0, %c0_i32 : i32, i32
  }
  func.func @transform_7(%arg0: i32) -> (i32, i32) {
    %c0_i32 = arith.constant 0 : i32
    %c0_i32_0 = arith.constant 0 : i32
    return %arg0, %c0_i32 : i32, i32
  }
}

</mosaic_0001>

<bundles_post_ra>
// kernel: block_forward.1
= control target key start
LH: loop header
LB: loop body
LE: loop exit
PB: predicated region body
PF: predicated region fallthrough
CT: control target
= control target key end

     0   :  { %13 = vsyncpa [#allocation3], 0  ;;  %s962_s0 = inlined_call_operand.vmem [shape: f32[16,32], index: 0, kind: input, shape index: {}]   ;;  %s963_s1 = inlined_call_operand.vmem [shape: f32[16,32], index: 1, kind: input, shape index: {}, may-alias: {1,7}]   ;;  %s964_s2 = inlined_call_operand.vmem [shape: f32[1,32], index: 2, kind: input, shape index: {}]   ;;  %s965_s3 = inlined_call_operand.vmem [shape: f32[1,32], index: 3, kind: input, shape index: {}]   ;;  %s966_s4 = inlined_call_operand.vmem [shape: f32[32,32], index: 4, kind: input, shape index: {}]   ;;  %s967_s5 = inlined_call_operand.hbm [shape: f32[1,32], index: 5, kind: input, shape index: {}]   ;;  %s968_s6 = inlined_call_operand.hbm [shape: f32[16,32], index: 6, kind: output, shape index: {0}]   ;;  %s969_s7 = inlined_call_operand.vmem [shape: f32[16,32], index: 7, kind: output, shape index: {1}, may-alias: {1,7}]  }
   0x1   :  { %14 = vsyncpa [#allocation4], 0 }
   0x2   :  { %16 = vsyncpa [#allocation4 + $0x1], 0  ;;  %s798_s24 = smov 0   ;;  %s800_s25 = smov 0  }
   0x3   :  { %s802_s26 = smov 0   ;;  %s804_s27 = smov 0  }
   0x4 LB: > { %s819_s28 = sadd.s32 4294967295, %s751_s27   ;;  %s562_s29 = sadd.s32 4294967294, %s751_s27   ;;  %s751_s27 = sphi %s804_s27, %s985_s27   ;;  %s747_s26 = sphi %s802_s26, %s984_s26   ;;  %s743_s25 = sphi %s800_s25, %s983_s25   ;;  %s739_s24 = sphi %s798_s24, %s982_s24  }
   0x5   : > { %s823_s30 = sadd.s32 1, %s751_s27   ;;  %s165_s8 = sadd.s32 1, %s747_s26 }
   0x6   : > { %s162_s9 = ssub.s32 %s751_s27, %s823_s30  ;;  %p175_p0 = scmp.ne.s32.totalorder %s747_s26, %s743_s25 }
   0x7   : > { %p163_p1 = scmp.eq.s32.totalorder %s162_s9, 0  ;;  %p176_p2 = scmp.eq.s32.totalorder %s819_s28, 1 }
   0x8   : > { %p181_p3 = scmp.ne.s32.totalorder %s743_s25, %s739_s24  ;;  %p182_p4 = scmp.eq.s32.totalorder %s562_s29, 1 }
   0x9   : > { %s834_s10 = scalar_select %p163_p1, %s747_s26, %s165_s8  }
   0xa   : > { %p836_p5 = por %p176_p2, %p175_p0  ;;  %p840_p6 = por %p182_p4, %p181_p3 }
   0xb   : > { %p563_p7 = scmp.ge.s32.totalorder %s751_s27, 1  ;;  %p215_p8 = scmp.lt.s32.totalorder %s751_s27, 3 }
   0xc   : > { %s973_s11 = scalar_select %p836_p5, 1, 0 }
   0xd   : > { %s974_s12 = scalar_select %p840_p6, 1, 0 }
   0xe   : > { %p970_p9 = scmp.eq.s32.totalorder %s819_s28, 0  ;;  %p847_p10 = pnand %p563_p7, %p215_p8 }
   0xf   : > { %s753_s14 = smov [#allocation2]   ;;  %s657_s19 = scalar_lea.hbm %s967_s5, 16 }
  0x10   : > { %s975_s13 = scalar_select %p847_p10, 1, 0 }
  0x11   : > { %s237_s15 = sshll.u32 %s753_s14, 4  ;;  %p608_p11 = pneg %p847_p10  ;;  %s238_s15 = int_to_ptr.vmem [resolvable:$true] %s237_s15 }
  0x12   : > { %p658_p13 = scmp.ne.s32.totalorder %s967_s5, %s657_s19  ;;  %p664_p3 = scmp.lt.u32.totalorder %s657_s19, %s967_s5 }
  0x13   : > { %p855_p12 = pnand %p970_p9, %p608_p11 }
  0x15   : > { %p659_p0 = pneg %p855_p12 }
  0x17   : > { %p660_p1 = pnand %p659_p0, %p658_p13 }
  0x19   : > { %p661_p2 = pneg %p660_p1 }
  0x1b   : > { %p666_p4 = pnand %p664_p3, %p661_p2 }
  0x1d   : > { %669 = shalt.err (!%p666_p4)
}
  0x1e   : > { %s670_s29 = scalar_lea.vmem %s238_s15, 16  ;;  %s677_s8 = scalar_lea.vmem %s238_s15, 32 }
  0x1f   : > { %p671_p7 = scmp.ne.s32.totalorder %s238_s15, %s670_s29  ;;  %p678_p9 = scmp.lt.s32.totalorder %s238_s15, %s238_s15 }
  0x20   : > { %p679_p6 = scmp.lt.s32.totalorder %s677_s8, %s670_s29 }
  0x21   : > { %p673_p8 = pnand %p671_p7, %p659_p0 }
  0x22   : > { %p680_p5 = por %p679_p6, %p678_p9 }
  0x23   : > { %p674_p11 = pneg %p673_p8 }
  0x25   : > { %p681_p10 = pnand %p680_p5, %p674_p11 }
  0x27   : > { %684 = shalt.err (!%p681_p10)
}
  0x28   : > { %611 = dma.hbm_to_vmem [thread:$0]  (!%p855_p12), %s967_s5, 16, %s238_s15, [#allocation3]  }
  0x29   : > { %p977_p13 = scmp.ne.s32.totalorder %s975_s13, 0 }
  0x2a   : > { %p978_p1 = scmp.eq.s32.totalorder (!%p977_p13), %s819_s28, 0 }
  0x2b   : > { %264 = sbr.rel (%p977_p13) target bundleno = 602 (0x25a), region = 44 }
  0x32   : > { %730 = dma.done.wait (%p978_p1), [#allocation3], 16   ;;  %p979_p0 = pmov %p978_p1 }
  0x33   : > { %p303_p6 = scmp.lt.s32.totalorder %s819_s28, 1  ;;  %vm321_vm0 = vcmask 261120   ;;  %v349_v9 = vld [vmem:[%s966_s4] sm:$0xff]  ;;  %v350_v10 = vld [vmem:[%s966_s4 + $0x8] sm:$0xff]  ;;  %v351_v11 = vld [vmem:[%s966_s4 + $0x10] sm:$0xff]  ;;  %v754_v12 = vmov 0.0|0.0  }
  0x34   : > { %732 = vsyncadd (%p979_p0), [#allocation3], 4294967280  ;;  %596 = vmatprep.subr.bf16.mxu0 %v754_v12  ;;  %v597_v13 = vpack.c.bf16 %v350_v10, %v349_v9  ;;  %v352_v14 = vld [vmem:[%s966_s4 + $0x18] sm:$0xff]  ;;  %vm755_vm1 = vmmov 0   ;;  %v756_v15 = vmov 0.0   ;;  %s294_s23 = sand.u32 1, %s743_s25  }
  0x35   : > { %s304_s17 = scalar_select %p303_p6, %s819_s28, 1  ;;  %593 = vmatprep.mubr.msk.f32.mxu0 %vm755_vm1, %v756_v15  ;;  %v600_v16 = vpack.c.bf16 %v352_v14, %v351_v11  ;;  %v572_v21 = vld [vmem:[%s964_s2] ss:$0 sm:$0xff] }
  0x36   : > { %598 = vmatpush3.bf16.msra.mxu0 %v597_v13  ;;  %v573_v23 = vld [vmem:[%s965_s3] ss:$0 sm:$0xff]  ;;  %s577_s8 = sshll.u32 %s819_s28, 7  ;;  %s435_s16 = scalar_lea.sflag [#allocation4], %s294_s23 }
  0x37   : > { %s569_s18 = sshll.u32 %s304_s17, 3  ;;  %599 = vmatprep.subr.bf16.mxu0 %v754_v12  ;;  %v574_v26 = vld [vmem:[#allocation2] ss:$0 sm:$0xff]  ;;  %s919_s19 = scalar_lea.hbm %s968_s6, %s577_s8 }
  0x38   : > { %s306_s20 = scalar_lea.vmem %s962_s0, %s569_s18  ;;  %s310_s13 = scalar_lea.vmem %s963_s1, %s569_s18 }
  0x39   : > { %s314_s29 = scalar_lea.vmem %s969_s7, %s569_s18  ;;  %v318_v0 = vld [vmem:[%s306_s20] sm:$0xff]  ;;  %p980_p9 = scmp.ne.s32.totalorder %s973_s11, 0 }
  0x3a   : > { %v319_v1 = vld [vmem:[%s310_s13] sm:$0xff]  ;;  %601 = vmatpush3.bf16.msra.mxu0 %v600_v16  ;;  %s757_s28 = smov [#allocation5]  }
  0x3b   : > { %v320_v2 = vadd.f32 %v319_v1, %v318_v0  ;;  %s689_s21 = sshll.u32 %s757_s28, 4  ;;  %s690_s21 = int_to_ptr.vmem [resolvable:$false] %s689_s21 }
  0x3c   : > { %s691_s15 = scalar_lea.vmem %s690_s21, 256 }
  0x3d   : > { %v322_v3 = vsel %vm321_vm0, %v320_v2, 0.0  ;;  %433 = vst.msk [vmem:[%s314_s29] sm:$0xff] %vm321_vm0, %v320_v2  ;;  %s568_s29 = sshll.u32 %s294_s23, 3 }
  0x3e   : > { %323 = vadd.xlane.f32.xlu0 %v322_v3  ;;  %s296_s9 = scalar_lea.vmem [#allocation5], %s568_s29 }
  0x3f   : > { %s452_s14 = sshll.u32 %s296_s9, 4  ;;  %s921_s14 = int_to_ptr.vmem [resolvable:$true] %s452_s14 }
  0x40   : > { %s685_s20 = scalar_lea.vmem %s921_s14, 128  ;;  %p692_p2 = scmp.lt.s32.totalorder %s921_s14, %s690_s21 }
  0x41   : > { %p686_p5 = scmp.ne.s32.totalorder %s921_s14, %s685_s20  ;;  %p693_p3 = scmp.lt.s32.totalorder %s691_s15, %s685_s20 }
  0x43   : > { %p687_p10 = pnand %p686_p5, %p980_p9  ;;  %p694_p4 = por %p693_p3, %p692_p2 }
  0x45   : > { %p688_p12 = pneg %p687_p10 }
  0x47   : > { %p695_p7 = pnand %p694_p4, %p688_p12 }
  0xcb   : > { %v324_v4 = vpop.xlane.xlu0 %323 }
  0xcc   : > { %v325_v5 = vmul.f32 0.03125, %v324_v4 }
  0xce   : > { %v326_v6 = vsub.f32 %v320_v2, %v325_v5 }
  0xd0   : > { %v327_v7 = vmul.f32 %v326_v6, %v326_v6 }
  0xd2   : > { %v328_v8 = vsel %vm321_vm0, %v327_v7, 0.0 }
  0xd3   : > { %329 = vadd.xlane.f32.xlu0 %v328_v8 }
 0x160   : > { %v330_v17 = vpop.xlane.xlu0 %329 }
 0x161   : > { %v331_v18 = vmul.f32 0.03125, %v330_v17 }
 0x163   : > { %v332_v19 = vadd.f32 1e-05, %v331_v18 }
 0x165   : > { %655 = vrsqrt.f32 %v332_v19 }
 0x16f   : > { %v656_v20 = vpop.eup %655 }
 0x170   : > { %v334_v22 = vmul.f32 %v656_v20, %v326_v6 }
 0x172   : > { %v341_v24 = vmul.f32 %v572_v21, %v334_v22 }
 0x174   : > { %v348_v25 = vadd.f32 %v573_v23, %v341_v24 }
 0x176   : > { %594 = vmatmul.mubr.msk.f32.vlgmr.msra.gmra.mrb[0].mxu0 %vm321_vm0, %v348_v25 }
 0x249   : > { %v428_v27 = vpop.f32.mrb[0].mxu0 }
 0x24a   : > { %v429_v28 = vadd.f32 %v574_v26, %v428_v27  ;;  %v595_v29 = vpop.f32.mrb[1].mxu0 }
 0x24c   : > { %432 = vst.msk [vmem:[%s296_s9] sm:$0xff] %vm321_vm0, %v429_v28 }
 0x24d   : > { %698 = shalt.err (!%p695_p7)
}
 0x24e   : > { %s699_s13 = scalar_lea.hbm %s919_s19, 128  ;;  %s703_s29 = scalar_lea.hbm %s968_s6, 256 }
 0x24f   : > { %p700_p8 = scmp.ne.s32.totalorder %s919_s19, %s699_s13  ;;  %p704_p1 = scmp.lt.u32.totalorder %s919_s19, %s968_s6 }
 0x250   : > { %p705_p0 = scmp.lt.u32.totalorder %s703_s29, %s699_s13  ;;  %p707_p5 = scmp.lt.u32.totalorder %s699_s13, %s919_s19 }
 0x251   : > { %p701_p11 = pnand %p700_p8, %p980_p9 }
 0x252   : > { %p706_p6 = por %p705_p0, %p704_p1 }
 0x253   : > { %p702_p13 = pneg %p701_p11 }
 0x254   : > { %p708_p10 = por %p707_p5, %p706_p6 }
 0x256   : > { %p709_p12 = pnand %p708_p10, %p702_p13 }
 0x258   : > { %712 = shalt.err (!%p709_p12)
}
 0x259   : > { %606 = dma.vmem_to_hbm [thread:$0]  (%p980_p9), %s921_s14, 128, %s919_s19, %s435_s16  }
 0x25a PF: > { %p618_p2 = scmp.ge.s32.totalorder %s751_s27, 2  ;;  %s467_s17 = sand.u32 1, %s739_s24  }
 0x25b   : > { %p981_p3 = scmp.ne.s32.totalorder %s974_s12, 0  ;;  %s468_s18 = scalar_lea.sflag [#allocation4], %s467_s17 }
 0x25d   : > { %p613_p4 = pnand %p618_p2, %p981_p3 }
 0x25f   : > { %734 = dma.done.wait (!%p613_p4), %s468_s18, 128  }
 0x260   : > { %736 = vsyncadd (!%p613_p4), %s468_s18, 4294967168  ;;  %p19_p7 = scmp.ge.s32.totalorder %s823_s30, 4   ;;  %s982_s24 = smov %s743_s25 }
 0x261   : > { %s983_s25 = smov %s747_s26  ;;  %s984_s26 = smov %s834_s10 }
 0x262   : > { %s985_s27 = smov %s823_s30  ;;  %21 = sbr.rel (!%p19_p7) target bundleno = 4 (0x4), region = 99 }
 0x269   :  { %480 = vsyncpa [#allocation3], 1 }
 0x26a   :  { %482 = vsyncpa [#allocation3 + $0x1], 1 }
 0x26b   :  { %483 = vsyncpa [#allocation4], 1 }
 0x26c   :  { %485 = vsyncpa [#allocation4 + $0x1], 1 }

</bundles_post_ra>
